<compile_context>
chip_gen: v6e
topology: v6e:2x2x1
jax: 0.10.0
libtpu: 0.0.40
codegen_flags: <defaults>
</compile_context>

<pallas_src>
import functools

import jax
import jax.numpy as jnp
from jax.experimental import pallas as pl
from jax.experimental.pallas import tpu as pltpu

K = 5            # conv kernel size
DIL_L = 10       # local-path dilation
DIL_G = 1        # global-path dilation
_CENTER = (K - 1) // 2


def _make_kernel(L, Cout):
    """Build the fused kernel for sample length L and (padded) Cout channels."""

    def kernel(x_ref, w1_ref, w2_ref, out_ref):
        # x_ref  : (Cin, bt*L)         bt samples laid out along lanes
        # w1_ref : (2*K*Cout, Cin)     [local taps ; global taps], tap-major per path
        # w2_ref : (2*K*Cout, 2*Cout)  block-diagonal over the stacked intermediate
        # out_ref: (3*Cout, bt*L)
        x = x_ref[...]
        w1 = w1_ref[...]
        w2 = w2_ref[...]
        BL = x.shape[1]
        KC = K * Cout

        # ---- boundary masks, hoisted: one iota + one mod + 8 compares, reused
        # by both layers (JAX does not reliably CSE these). (lane % L) also
        # zeros roll leakage across sample boundaries; L=2^k -> cheap AND.
        lane = jax.lax.broadcasted_iota(jnp.int32, (Cout, BL), 1)
        lane_mod = lane % L
        shifts = sorted({(t - _CENTER) * d
                         for t in range(K) if t != _CENTER
                         for d in (DIL_L, DIL_G)})
        masks = {s: (lane_mod < (L - s)) if s > 0 else (lane_mod >= (-s))
                 for s in shifts}

        def shift_lanes(v, s):
            # r[:, j] = v[:, j+s] if j+s stays inside the same length-L sample, else 0.
            if s == 0:
                return v
            r = pltpu.roll(v, shift=(-s) % BL, axis=1)
            return jnp.where(masks[s], r, 0.0)

        def dilated_sum(z, dil):
            # z: (K*Cout, BL) tap-major partial products.
            # Shift-after-matmul == 'same'-padded dilated conv (im2col-equivalent).
            acc = z[_CENTER * Cout:(_CENTER + 1) * Cout, :]       # center tap, shift 0
            for t in range(K):
                if t == _CENTER:
                    continue
                acc = acc + shift_lanes(z[t * Cout:(t + 1) * Cout, :],
                                        (t - _CENTER) * dil)
            return acc

        # ---- layer 1: ONE MXU call covers both paths' 5 taps.
        z1 = jnp.dot(w1, x, preferred_element_type=jnp.float32)   # (2*K*Cout, BL)
        # TODO(synk): activation hardcoded to ReLU (module default act=None would crash).
        h_l = jnp.maximum(dilated_sum(z1[0:KC, :], DIL_L), 0.0)
        h_g = jnp.maximum(dilated_sum(z1[KC:2 * KC, :], DIL_G), 0.0)
        h = jnp.concatenate([h_l, h_g], axis=0)                   # (2*Cout, BL)

        # ---- layer 2: ONE MXU call (block-diagonal weights, stacked intermediate).
        z2 = jnp.dot(w2, h, preferred_element_type=jnp.float32)   # (2*K*Cout, BL)
        x1 = jnp.maximum(dilated_sum(z2[0:KC, :], DIL_L), 0.0)
        x2 = jnp.maximum(dilated_sum(z2[KC:2 * KC, :], DIL_G), 0.0)

        # Lane-dense, sublane-aligned channel-band stores.
        out_ref[0:Cout, :] = x1
        out_ref[Cout:2 * Cout, :] = x2
        out_ref[2 * Cout:3 * Cout, :] = x1 - x2

    return kernel


def _flatten_taps(w):
    """PyTorch Conv1d weight (Cout, C, K) -> tap-major (K*Cout, C)."""
    cout, c, k = w.shape
    return jnp.transpose(w, (2, 0, 1)).reshape(k * cout, c)


def _stack_layer1(w1l, w1g):
    """(2*K*Cout, Cin): local tap-major block on top, global below."""
    return jnp.concatenate([_flatten_taps(w1l), _flatten_taps(w1g)], axis=0)


def _stack_layer2(w2l, w2g):
    """Block-diagonal (2*K*Cout, 2*Cout) over the stacked intermediate:
       rows [0 : K*Cout)        = local taps, reading intermediate channels [0:Cout)
       rows [K*Cout : 2*K*Cout) = global taps, reading channels [Cout:2*Cout)."""
    cout = w2l.shape[0]
    zeros = jnp.zeros((K * cout, cout), w2l.dtype)
    top = jnp.concatenate([_flatten_taps(w2l), zeros], axis=1)
    bot = jnp.concatenate([zeros, _flatten_taps(w2g)], axis=1)
    return jnp.concatenate([top, bot], axis=0)


def _pick_batch_tile(batch, L, bytes_per_sample, requested=None):
    if requested is not None:
        target = max(1, min(requested, batch))
    else:
        # A few MiB of (x + out) block data per grid step; the Pallas pipeline
        # double-buffers this (~2x in VMEM), still far below the 32 MiB default
        # scoped limit and v7x's 64 MiB physical VMEM.
        budget = 6 * 1024 * 1024
        target = max(1, min(batch, budget // max(1, bytes_per_sample)))
        # Keep >= 2 "parallel" grid steps when the batch allows, so both v7x
        # TensorCores get work (costs only ~0.35us extra on single-TC v5e/v6e).
        if batch >= 2:
            target = min(target, max(1, batch // 2))
    # Largest divisor of batch <= target whose lane extent stays 128-aligned.
    for d in range(target, 0, -1):
        if batch % d == 0 and ((d * L) % 128 == 0 or d == batch):
            return d
    return batch   # single full block (block dim == array dim is always legal)


def context_contrast(x, w1l, w2l, w1g, w2g, *, batch_tile=None):
    """x: (B, Cin, L) f32; weights in PyTorch Conv1d layout (Cout, Cin|Cout, K).

    Returns (B, 3*Cout, L) = concat([local, global, local - global], channel).
    For best performance keep L a multiple of 128 (lane-dense blocks/stores).
    """
    B, Cin, L = x.shape
    Cout = w1l.shape[0]

    # Pad Cout to a multiple of 8 so per-tap slices / output channel bands are
    # sublane-tile aligned inside the kernel (misaligned slices are not views).
    Cout_p = -(-Cout // 8) * 8
    if Cout_p != Cout:
        po = Cout_p - Cout
        w1l = jnp.pad(w1l, ((0, po), (0, 0), (0, 0)))
        w1g = jnp.pad(w1g, ((0, po), (0, 0), (0, 0)))
        w2l = jnp.pad(w2l, ((0, po), (0, po), (0, 0)))
        w2g = jnp.pad(w2g, ((0, po), (0, po), (0, 0)))

    # Wrapper-side weight fusion (tiny, one-time).
    w1s = _stack_layer1(w1l, w1g)            # (2*K*Cout_p, Cin)
    w2s = _stack_layer2(w2l, w2g)            # (2*K*Cout_p, 2*Cout_p)

    # Layout plumbing only: batch along lanes.
    x2d = jnp.transpose(x, (1, 0, 2)).reshape(Cin, B * L)

    bytes_per_sample = 4 * (Cin + 3 * Cout_p) * L
    bt = _pick_batch_tile(B, L, bytes_per_sample, batch_tile)
    BL = bt * L

    grid_spec = pltpu.PrefetchScalarGridSpec(
        num_scalar_prefetch=0,
        grid=(B // bt,),
        in_specs=[
            pl.BlockSpec((Cin, BL), lambda b: (0, b)),
            pl.BlockSpec((2 * K * Cout_p, Cin), lambda b: (0, 0)),
            pl.BlockSpec((2 * K * Cout_p, 2 * Cout_p), lambda b: (0, 0)),
        ],
        out_specs=pl.BlockSpec((3 * Cout_p, BL), lambda b: (0, b)),
    )

    flops = 2 * (2 * K * Cout_p) * (Cin + 2 * Cout_p) * B * L
    bytes_accessed = 4 * (Cin * B * L + 3 * Cout_p * B * L
                          + int(w1s.size) + int(w2s.size))
    cost = pl.CostEstimate(flops=flops, transcendentals=0,
                           bytes_accessed=bytes_accessed)

    out2d = pl.pallas_call(
        _make_kernel(L, Cout_p),
        out_shape=jax.ShapeDtypeStruct((3 * Cout_p, B * L), jnp.float32),
        grid_spec=grid_spec,
        compiler_params=pltpu.CompilerParams(
            dimension_semantics=("parallel",)),
        cost_estimate=cost,
    )(x2d, w1s, w2s)

    out = jnp.transpose(out2d.reshape(3 * Cout_p, B, L), (1, 0, 2))
    if Cout_p != Cout:
        out = jnp.concatenate(
            [out[:, 0:Cout], out[:, Cout_p:Cout_p + Cout],
             out[:, 2 * Cout_p:2 * Cout_p + Cout]], axis=1)
    return out


def _ref_forward(x, w1l, w2l, w1g, w2g):
    """Pure-JAX reference (mirrors PyTorch Conv1d padding='same', bias=False, ReLU)."""
    def conv(v, w, dil):
        pad = dil * (w.shape[-1] - 1) // 2
        return jax.lax.conv_general_dilated(
            v, w, window_strides=(1,), padding=[(pad, pad)],
            rhs_dilation=(dil,), dimension_numbers=('NCH', 'OIH', 'NCH'))
    x1 = jax.nn.relu(conv(jax.nn.relu(conv(x, w1l, DIL_L)), w2l, DIL_L))
    x2 = jax.nn.relu(conv(jax.nn.relu(conv(x, w1g, DIL_G)), w2g, DIL_G))
    return jnp.concatenate([x1, x2, x1 - x2], axis=1)


if __name__ == "__main__":
    B, Cin, Cout, L = 4, 4, 8, 256   # L multiple of 128 -> lane-dense blocks

    key = jax.random.PRNGKey(0)
    kx, k1, k2, k3, k4 = jax.random.split(key, 5)
    x = jax.random.normal(kx, (B, Cin, L), jnp.float32)
    # Conv1d weight layout: (out_ch, in_ch, K).
    w1l = 0.1 * jax.random.normal(k1, (Cout, Cin, K), jnp.float32)
    w2l = 0.1 * jax.random.normal(k2, (Cout, Cout, K), jnp.float32)
    w1g = 0.1 * jax.random.normal(k3, (Cout, Cin, K), jnp.float32)
    w2g = 0.1 * jax.random.normal(k4, (Cout, Cout, K), jnp.float32)

    out = context_contrast(x, w1l, w2l, w1g, w2g)
    out = jax.block_until_ready(out)

    ref = _ref_forward(x, w1l, w2l, w1g, w2g)
    assert out.shape == (B, 3 * Cout, L), out.shape
    assert jnp.allclose(out, ref, atol=1e-5, rtol=1e-5), \
        float(jnp.max(jnp.abs(out - ref)))

    print("KERNEL_OK")
</pallas_src>

<mosaic_0001>
module attributes {stable_mosaic.version = 11 : i64} {
  func.func @kernel(%arg0: i32, %arg1: memref<4x512xf32, #tpu.memory_space<vmem>>, %arg2: memref<80x4xf32, #tpu.memory_space<vmem>>, %arg3: memref<80x16xf32, #tpu.memory_space<vmem>>, %arg4: memref<24x512xf32, #tpu.memory_space<vmem>>) attributes {dimension_semantics = [#tpu.dimension_semantics<parallel>], iteration_bounds = array<i64: 2>, scalar_prefetch = 0 : i64, scratch_operands = 0 : i64, tpu.core_type = #tpu.core_type<tc>, window_params = [{transform_indices = @transform_0, window_bounds = array<i64: 4, 512>}, {pipeline_mode = #tpu.pipeline_mode<synchronous>, transform_indices = @transform_1, window_bounds = array<i64: 80, 4>}, {pipeline_mode = #tpu.pipeline_mode<synchronous>, transform_indices = @transform_2, window_bounds = array<i64: 80, 16>}, {transform_indices = @transform_3, window_bounds = array<i64: 24, 512>}]} {
    %c0 = arith.constant 0 : index
    %c0_0 = arith.constant 0 : index
    %0 = vector.load %arg1[%c0, %c0_0] : memref<4x512xf32, #tpu.memory_space<vmem>>, vector<4x512xf32>
    %c0_1 = arith.constant 0 : index
    %c0_2 = arith.constant 0 : index
    %1 = vector.load %arg2[%c0_1, %c0_2] : memref<80x4xf32, #tpu.memory_space<vmem>>, vector<80x4xf32>
    %c0_3 = arith.constant 0 : index
    %c0_4 = arith.constant 0 : index
    %2 = vector.load %arg3[%c0_3, %c0_4] : memref<80x16xf32, #tpu.memory_space<vmem>>, vector<80x16xf32>
    %3 = tpu.iota {dimensions = array<i32: 1>} : vector<8x512xi32>
    %c256_i32 = arith.constant 256 : i32
    %c0_i32 = arith.constant 0 : i32
    %4 = arith.cmpi eq, %c256_i32, %c0_i32 : i32
    %c1_i32 = arith.constant 1 : i32
    %5 = arith.select %4, %c1_i32, %c256_i32 : i32
    %6 = vector.broadcast %5 : i32 to vector<8x512xi32>
    %7 = arith.remsi %3, %6 : vector<8x512xi32>
    %c0_i32_5 = arith.constant 0 : i32
    %8 = vector.broadcast %c0_i32_5 : i32 to vector<8x512xi32>
    %9 = arith.cmpi ne, %7, %8 : vector<8x512xi32>
    %c0_i32_6 = arith.constant 0 : i32
    %10 = vector.broadcast %c0_i32_6 : i32 to vector<8x512xi32>
    %11 = arith.cmpi slt, %7, %10 : vector<8x512xi32>
    %c0_i32_7 = arith.constant 0 : i32
    %12 = arith.cmpi slt, %5, %c0_i32_7 : i32
    %13 = vector.broadcast %12 : i1 to vector<8x512xi1>
    %14 = vector.broadcast %13 : vector<8x512xi1> to vector<8x512xi1>
    %15 = arith.xori %11, %14 : vector<8x512xi1>
    %16 = arith.andi %15, %9 : vector<8x512xi1>
    %17 = vector.broadcast %5 : i32 to vector<8x512xi32>
    %18 = arith.addi %7, %17 : vector<8x512xi32>
    %19 = arith.select %16, %18, %7 : vector<8x512xi1>, vector<8x512xi32>
    %c20_i32 = arith.constant 20 : i32
    %20 = vector.broadcast %c20_i32 : i32 to vector<8x512xi32>
    %21 = arith.cmpi sge, %19, %20 : vector<8x512xi32>
    %c10_i32 = arith.constant 10 : i32
    %22 = vector.broadcast %c10_i32 : i32 to vector<8x512xi32>
    %23 = arith.cmpi sge, %19, %22 : vector<8x512xi32>
    %c2_i32 = arith.constant 2 : i32
    %24 = vector.broadcast %c2_i32 : i32 to vector<8x512xi32>
    %25 = arith.cmpi sge, %19, %24 : vector<8x512xi32>
    %c1_i32_8 = arith.constant 1 : i32
    %26 = vector.broadcast %c1_i32_8 : i32 to vector<8x512xi32>
    %27 = arith.cmpi sge, %19, %26 : vector<8x512xi32>
    %c255_i32 = arith.constant 255 : i32
    %28 = vector.broadcast %c255_i32 : i32 to vector<8x512xi32>
    %29 = arith.cmpi slt, %19, %28 : vector<8x512xi32>
    %c254_i32 = arith.constant 254 : i32
    %30 = vector.broadcast %c254_i32 : i32 to vector<8x512xi32>
    %31 = arith.cmpi slt, %19, %30 : vector<8x512xi32>
    %c246_i32 = arith.constant 246 : i32
    %32 = vector.broadcast %c246_i32 : i32 to vector<8x512xi32>
    %33 = arith.cmpi slt, %19, %32 : vector<8x512xi32>
    %c236_i32 = arith.constant 236 : i32
    %34 = vector.broadcast %c236_i32 : i32 to vector<8x512xi32>
    %35 = arith.cmpi slt, %19, %34 : vector<8x512xi32>
    %cst = arith.constant dense<0.000000e+00> : vector<80x512xf32>
    %36 = tpu.matmul %1, %0, %cst {dimension_numbers = #tpu.dot_dimension_numbers<[1], [0], [0], [1], [0, 0, 1, 1], [], []>} : vector<80x4xf32>, vector<4x512xf32>, vector<80x512xf32> -> vector<80x512xf32>
    %37 = vector.extract_strided_slice %36 {offsets = [0, 0], sizes = [40, 512], strides = [1, 1]} : vector<80x512xf32> to vector<40x512xf32>
    %38 = vector.extract_strided_slice %37 {offsets = [16, 0], sizes = [8, 512], strides = [1, 1]} : vector<40x512xf32> to vector<8x512xf32>
    %39 = vector.extract_strided_slice %37 {offsets = [0, 0], sizes = [8, 512], strides = [1, 1]} : vector<40x512xf32> to vector<8x512xf32>
    %c20_i32_9 = arith.constant 20 : i32
    %40 = tpu.dynamic_rotate %39 by %c20_i32_9 dim 1 : vector<8x512xf32>, i32 -> vector<8x512xf32>
    %cst_10 = arith.constant 0.000000e+00 : f32
    %41 = vector.broadcast %cst_10 : f32 to vector<8x512xf32>
    %42 = arith.select %21, %40, %41 : vector<8x512xi1>, vector<8x512xf32>
    %43 = arith.addf %38, %42 : vector<8x512xf32>
    %44 = vector.extract_strided_slice %37 {offsets = [8, 0], sizes = [8, 512], strides = [1, 1]} : vector<40x512xf32> to vector<8x512xf32>
    %c10_i32_11 = arith.constant 10 : i32
    %45 = tpu.dynamic_rotate %44 by %c10_i32_11 dim 1 : vector<8x512xf32>, i32 -> vector<8x512xf32>
    %cst_12 = arith.constant 0.000000e+00 : f32
    %46 = vector.broadcast %cst_12 : f32 to vector<8x512xf32>
    %47 = arith.select %23, %45, %46 : vector<8x512xi1>, vector<8x512xf32>
    %48 = arith.addf %43, %47 : vector<8x512xf32>
    %49 = vector.extract_strided_slice %37 {offsets = [24, 0], sizes = [8, 512], strides = [1, 1]} : vector<40x512xf32> to vector<8x512xf32>
    %c502_i32 = arith.constant 502 : i32
    %50 = tpu.dynamic_rotate %49 by %c502_i32 dim 1 : vector<8x512xf32>, i32 -> vector<8x512xf32>
    %cst_13 = arith.constant 0.000000e+00 : f32
    %51 = vector.broadcast %cst_13 : f32 to vector<8x512xf32>
    %52 = arith.select %33, %50, %51 : vector<8x512xi1>, vector<8x512xf32>
    %53 = arith.addf %48, %52 : vector<8x512xf32>
    %54 = vector.extract_strided_slice %37 {offsets = [32, 0], sizes = [8, 512], strides = [1, 1]} : vector<40x512xf32> to vector<8x512xf32>
    %c492_i32 = arith.constant 492 : i32
    %55 = tpu.dynamic_rotate %54 by %c492_i32 dim 1 : vector<8x512xf32>, i32 -> vector<8x512xf32>
    %cst_14 = arith.constant 0.000000e+00 : f32
    %56 = vector.broadcast %cst_14 : f32 to vector<8x512xf32>
    %57 = arith.select %35, %55, %56 : vector<8x512xi1>, vector<8x512xf32>
    %58 = arith.addf %53, %57 : vector<8x512xf32>
    %cst_15 = arith.constant 0.000000e+00 : f32
    %59 = vector.broadcast %cst_15 : f32 to vector<8x512xf32>
    %60 = arith.maximumf %58, %59 : vector<8x512xf32>
    %61 = vector.extract_strided_slice %36 {offsets = [40, 0], sizes = [40, 512], strides = [1, 1]} : vector<80x512xf32> to vector<40x512xf32>
    %62 = vector.extract_strided_slice %61 {offsets = [16, 0], sizes = [8, 512], strides = [1, 1]} : vector<40x512xf32> to vector<8x512xf32>
    %63 = vector.extract_strided_slice %61 {offsets = [0, 0], sizes = [8, 512], strides = [1, 1]} : vector<40x512xf32> to vector<8x512xf32>
    %c2_i32_16 = arith.constant 2 : i32
    %64 = tpu.dynamic_rotate %63 by %c2_i32_16 dim 1 : vector<8x512xf32>, i32 -> vector<8x512xf32>
    %cst_17 = arith.constant 0.000000e+00 : f32
    %65 = vector.broadcast %cst_17 : f32 to vector<8x512xf32>
    %66 = arith.select %25, %64, %65 : vector<8x512xi1>, vector<8x512xf32>
    %67 = arith.addf %62, %66 : vector<8x512xf32>
    %68 = vector.extract_strided_slice %61 {offsets = [8, 0], sizes = [8, 512], strides = [1, 1]} : vector<40x512xf32> to vector<8x512xf32>
    %c1_i32_18 = arith.constant 1 : i32
    %69 = tpu.dynamic_rotate %68 by %c1_i32_18 dim 1 : vector<8x512xf32>, i32 -> vector<8x512xf32>
    %cst_19 = arith.constant 0.000000e+00 : f32
    %70 = vector.broadcast %cst_19 : f32 to vector<8x512xf32>
    %71 = arith.select %27, %69, %70 : vector<8x512xi1>, vector<8x512xf32>
    %72 = arith.addf %67, %71 : vector<8x512xf32>
    %73 = vector.extract_strided_slice %61 {offsets = [24, 0], sizes = [8, 512], strides = [1, 1]} : vector<40x512xf32> to vector<8x512xf32>
    %c511_i32 = arith.constant 511 : i32
    %74 = tpu.dynamic_rotate %73 by %c511_i32 dim 1 : vector<8x512xf32>, i32 -> vector<8x512xf32>
    %cst_20 = arith.constant 0.000000e+00 : f32
    %75 = vector.broadcast %cst_20 : f32 to vector<8x512xf32>
    %76 = arith.select %29, %74, %75 : vector<8x512xi1>, vector<8x512xf32>
    %77 = arith.addf %72, %76 : vector<8x512xf32>
    %78 = vector.extract_strided_slice %61 {offsets = [32, 0], sizes = [8, 512], strides = [1, 1]} : vector<40x512xf32> to vector<8x512xf32>
    %c510_i32 = arith.constant 510 : i32
    %79 = tpu.dynamic_rotate %78 by %c510_i32 dim 1 : vector<8x512xf32>, i32 -> vector<8x512xf32>
    %cst_21 = arith.constant 0.000000e+00 : f32
    %80 = vector.broadcast %cst_21 : f32 to vector<8x512xf32>
    %81 = arith.select %31, %79, %80 : vector<8x512xi1>, vector<8x512xf32>
    %82 = arith.addf %77, %81 : vector<8x512xf32>
    %cst_22 = arith.constant 0.000000e+00 : f32
    %83 = vector.broadcast %cst_22 : f32 to vector<8x512xf32>
    %84 = arith.maximumf %82, %83 : vector<8x512xf32>
    %85 = tpu.concatenate %60, %84 in 0 : vector<8x512xf32>, vector<8x512xf32> -> vector<16x512xf32>
    %cst_23 = arith.constant dense<0.000000e+00> : vector<80x512xf32>
    %86 = tpu.matmul %2, %85, %cst_23 {dimension_numbers = #tpu.dot_dimension_numbers<[1], [0], [0], [1], [0, 0, 1, 1], [], []>} : vector<80x16xf32>, vector<16x512xf32>, vector<80x512xf32> -> vector<80x512xf32>
    %87 = vector.extract_strided_slice %86 {offsets = [0, 0], sizes = [40, 512], strides = [1, 1]} : vector<80x512xf32> to vector<40x512xf32>
    %88 = vector.extract_strided_slice %87 {offsets = [16, 0], sizes = [8, 512], strides = [1, 1]} : vector<40x512xf32> to vector<8x512xf32>
    %89 = vector.extract_strided_slice %87 {offsets = [0, 0], sizes = [8, 512], strides = [1, 1]} : vector<40x512xf32> to vector<8x512xf32>
    %c20_i32_24 = arith.constant 20 : i32
    %90 = tpu.dynamic_rotate %89 by %c20_i32_24 dim 1 : vector<8x512xf32>, i32 -> vector<8x512xf32>
    %cst_25 = arith.constant 0.000000e+00 : f32
    %91 = vector.broadcast %cst_25 : f32 to vector<8x512xf32>
    %92 = arith.select %21, %90, %91 : vector<8x512xi1>, vector<8x512xf32>
    %93 = arith.addf %88, %92 : vector<8x512xf32>
    %94 = vector.extract_strided_slice %87 {offsets = [8, 0], sizes = [8, 512], strides = [1, 1]} : vector<40x512xf32> to vector<8x512xf32>
    %c10_i32_26 = arith.constant 10 : i32
    %95 = tpu.dynamic_rotate %94 by %c10_i32_26 dim 1 : vector<8x512xf32>, i32 -> vector<8x512xf32>
    %cst_27 = arith.constant 0.000000e+00 : f32
    %96 = vector.broadcast %cst_27 : f32 to vector<8x512xf32>
    %97 = arith.select %23, %95, %96 : vector<8x512xi1>, vector<8x512xf32>
    %98 = arith.addf %93, %97 : vector<8x512xf32>
    %99 = vector.extract_strided_slice %87 {offsets = [24, 0], sizes = [8, 512], strides = [1, 1]} : vector<40x512xf32> to vector<8x512xf32>
    %c502_i32_28 = arith.constant 502 : i32
    %100 = tpu.dynamic_rotate %99 by %c502_i32_28 dim 1 : vector<8x512xf32>, i32 -> vector<8x512xf32>
    %cst_29 = arith.constant 0.000000e+00 : f32
    %101 = vector.broadcast %cst_29 : f32 to vector<8x512xf32>
    %102 = arith.select %33, %100, %101 : vector<8x512xi1>, vector<8x512xf32>
    %103 = arith.addf %98, %102 : vector<8x512xf32>
    %104 = vector.extract_strided_slice %87 {offsets = [32, 0], sizes = [8, 512], strides = [1, 1]} : vector<40x512xf32> to vector<8x512xf32>
    %c492_i32_30 = arith.constant 492 : i32
    %105 = tpu.dynamic_rotate %104 by %c492_i32_30 dim 1 : vector<8x512xf32>, i32 -> vector<8x512xf32>
    %cst_31 = arith.constant 0.000000e+00 : f32
    %106 = vector.broadcast %cst_31 : f32 to vector<8x512xf32>
    %107 = arith.select %35, %105, %106 : vector<8x512xi1>, vector<8x512xf32>
    %108 = arith.addf %103, %107 : vector<8x512xf32>
    %cst_32 = arith.constant 0.000000e+00 : f32
    %109 = vector.broadcast %cst_32 : f32 to vector<8x512xf32>
    %110 = arith.maximumf %108, %109 : vector<8x512xf32>
    %111 = vector.extract_strided_slice %86 {offsets = [40, 0], sizes = [40, 512], strides = [1, 1]} : vector<80x512xf32> to vector<40x512xf32>
    %112 = vector.extract_strided_slice %111 {offsets = [16, 0], sizes = [8, 512], strides = [1, 1]} : vector<40x512xf32> to vector<8x512xf32>
    %113 = vector.extract_strided_slice %111 {offsets = [0, 0], sizes = [8, 512], strides = [1, 1]} : vector<40x512xf32> to vector<8x512xf32>
    %c2_i32_33 = arith.constant 2 : i32
    %114 = tpu.dynamic_rotate %113 by %c2_i32_33 dim 1 : vector<8x512xf32>, i32 -> vector<8x512xf32>
    %cst_34 = arith.constant 0.000000e+00 : f32
    %115 = vector.broadcast %cst_34 : f32 to vector<8x512xf32>
    %116 = arith.select %25, %114, %115 : vector<8x512xi1>, vector<8x512xf32>
    %117 = arith.addf %112, %116 : vector<8x512xf32>
    %118 = vector.extract_strided_slice %111 {offsets = [8, 0], sizes = [8, 512], strides = [1, 1]} : vector<40x512xf32> to vector<8x512xf32>
    %c1_i32_35 = arith.constant 1 : i32
    %119 = tpu.dynamic_rotate %118 by %c1_i32_35 dim 1 : vector<8x512xf32>, i32 -> vector<8x512xf32>
    %cst_36 = arith.constant 0.000000e+00 : f32
    %120 = vector.broadcast %cst_36 : f32 to vector<8x512xf32>
    %121 = arith.select %27, %119, %120 : vector<8x512xi1>, vector<8x512xf32>
    %122 = arith.addf %117, %121 : vector<8x512xf32>
    %123 = vector.extract_strided_slice %111 {offsets = [24, 0], sizes = [8, 512], strides = [1, 1]} : vector<40x512xf32> to vector<8x512xf32>
    %c511_i32_37 = arith.constant 511 : i32
    %124 = tpu.dynamic_rotate %123 by %c511_i32_37 dim 1 : vector<8x512xf32>, i32 -> vector<8x512xf32>
    %cst_38 = arith.constant 0.000000e+00 : f32
    %125 = vector.broadcast %cst_38 : f32 to vector<8x512xf32>
    %126 = arith.select %29, %124, %125 : vector<8x512xi1>, vector<8x512xf32>
    %127 = arith.addf %122, %126 : vector<8x512xf32>
    %128 = vector.extract_strided_slice %111 {offsets = [32, 0], sizes = [8, 512], strides = [1, 1]} : vector<40x512xf32> to vector<8x512xf32>
    %c510_i32_39 = arith.constant 510 : i32
    %129 = tpu.dynamic_rotate %128 by %c510_i32_39 dim 1 : vector<8x512xf32>, i32 -> vector<8x512xf32>
    %cst_40 = arith.constant 0.000000e+00 : f32
    %130 = vector.broadcast %cst_40 : f32 to vector<8x512xf32>
    %131 = arith.select %31, %129, %130 : vector<8x512xi1>, vector<8x512xf32>
    %132 = arith.addf %127, %131 : vector<8x512xf32>
    %cst_41 = arith.constant 0.000000e+00 : f32
    %133 = vector.broadcast %cst_41 : f32 to vector<8x512xf32>
    %134 = arith.maximumf %132, %133 : vector<8x512xf32>
    %c0_42 = arith.constant 0 : index
    %c0_43 = arith.constant 0 : index
    %135 = vector.load %arg4[%c0_42, %c0_43] : memref<24x512xf32, #tpu.memory_space<vmem>>, vector<8x512xf32>
    tpu.vector_store %arg4[%c0_42, %c0_43], %110 {strides = array<i32>} : memref<24x512xf32, #tpu.memory_space<vmem>>, vector<8x512xf32>,
    %c8 = arith.constant 8 : index
    %c0_44 = arith.constant 0 : index
    %136 = vector.load %arg4[%c8, %c0_44] : memref<24x512xf32, #tpu.memory_space<vmem>>, vector<8x512xf32>
    tpu.vector_store %arg4[%c8, %c0_44], %134 {strides = array<i32>} : memref<24x512xf32, #tpu.memory_space<vmem>>, vector<8x512xf32>,
    %137 = arith.subf %110, %134 : vector<8x512xf32>
    %c16 = arith.constant 16 : index
    %c0_45 = arith.constant 0 : index
    %138 = vector.load %arg4[%c16, %c0_45] : memref<24x512xf32, #tpu.memory_space<vmem>>, vector<8x512xf32>
    tpu.vector_store %arg4[%c16, %c0_45], %137 {strides = array<i32>} : memref<24x512xf32, #tpu.memory_space<vmem>>, vector<8x512xf32>,
    return
  }
  func.func @transform_0(%arg0: i32) -> (i32, i32) {
    %c0_i32 = arith.constant 0 : i32
    %c0_i32_0 = arith.constant 0 : i32
    return %c0_i32, %arg0 : i32, i32
  }
  func.func @transform_1(%arg0: i32) -> (i32, i32) {
    %c0_i32 = arith.constant 0 : i32
    %c0_i32_0 = arith.constant 0 : i32
    %c0_i32_1 = arith.constant 0 : i32
    return %c0_i32, %c0_i32_0 : i32, i32
  }
  func.func @transform_2(%arg0: i32) -> (i32, i32) {
    %c0_i32 = arith.constant 0 : i32
    %c0_i32_0 = arith.constant 0 : i32
    %c0_i32_1 = arith.constant 0 : i32
    return %c0_i32, %c0_i32_0 : i32, i32
  }
  func.func @transform_3(%arg0: i32) -> (i32, i32) {
    %c0_i32 = arith.constant 0 : i32
    %c0_i32_0 = arith.constant 0 : i32
    return %c0_i32, %arg0 : i32, i32
  }
}

</mosaic_0001>

<bundles_post_ra>
// kernel: tpu_custom_call.1
= control target key start
LH: loop header
LB: loop body
LE: loop exit
PB: predicated region body
PF: predicated region fallthrough
CT: control target
= control target key end

     0   :  { %8 = vsyncpa [#allocation3], 0  ;;  %s2176_s0 = inlined_call_operand.vmem [shape: f32[4,1024], index: 0, kind: input, shape index: {}]   ;;  %s2177_s1 = inlined_call_operand.vmem [shape: f32[80,4], index: 1, kind: input, shape index: {}]   ;;  %s2178_s2 = inlined_call_operand.vmem [shape: f32[80,16], index: 2, kind: input, shape index: {}]   ;;  %s2179_s3 = inlined_call_operand.hbm [shape: f32[24,1024], index: 3, kind: output, shape index: {}]  }
   0x1   :  { %10 = vsyncpa [#allocation3 + $0x1], 0  ;;  %s1494_s12 = smov 0   ;;  %s1496_s13 = smov 0  }
   0x2   :  { %s1498_s14 = smov 0   ;;  %s1500_s15 = smov 0  }
   0x3 LB: > { %s1515_s16 = sadd.s32 4294967295, %s1459_s15   ;;  %s1290_s17 = sadd.s32 4294967294, %s1459_s15   ;;  %s1459_s15 = sphi %s1500_s15, %s2212_s15   ;;  %s1455_s14 = sphi %s1498_s14, %s2211_s14   ;;  %s1451_s13 = sphi %s1496_s13, %s2210_s13   ;;  %s1447_s12 = sphi %s1494_s12, %s2209_s12  }
   0x4   : > { %s1519_s18 = sadd.s32 1, %s1459_s15   ;;  %s91_s19 = sadd.s32 1, %s1455_s14 }
   0x5   : > { %s88_s20 = ssub.s32 %s1459_s15, %s1519_s18  ;;  %p101_p0 = scmp.ne.s32.totalorder %s1455_s14, %s1451_s13 }
   0x6   : > { %p89_p1 = scmp.eq.s32.totalorder %s88_s20, 0  ;;  %p102_p2 = scmp.eq.s32.totalorder %s1515_s16, 1 }
   0x7   : > { %p107_p3 = scmp.ne.s32.totalorder %s1451_s13, %s1447_s12  ;;  %p108_p4 = scmp.eq.s32.totalorder %s1290_s17, 1 }
   0x8   : > { %s1530_s21 = scalar_select %p89_p1, %s1455_s14, %s91_s19  }
   0x9   : > { %p1532_p5 = por %p102_p2, %p101_p0  ;;  %p1536_p6 = por %p108_p4, %p107_p3 }
   0xa   : > { %p1293_p7 = scmp.ge.s32.totalorder %s1459_s15, 1  ;;  %p141_p8 = scmp.lt.s32.totalorder %s1459_s15, 3 }
   0xc   : > { %p142_p9 = pnand %p1293_p7, %p141_p8 }
   0xd   : > { %s1294_s24 = sshll.u32 (!%p142_p9), %s1515_s16, 2  ;;  %s1462_s4 = smov (!%p142_p9), 20  }
   0xe   : > { %145 = sbr.rel (%p142_p9) target bundleno = 796 (0x31c), region = 32  ;;  %p166_p10 = scmp.lt.s32.totalorder (!%p142_p9), %s1294_s24, 7 }
   0xf   : > { %s1463_s5 = smov (!%p142_p9), 10   ;;  %s1464_s6 = smov (!%p142_p9), 118  }
  0x10   : > { %s1465_s7 = smov (!%p142_p9), 108   ;;  %s1466_s8 = smov (!%p142_p9), 2  }
  0x11   : > { %s1467_s9 = smov (!%p142_p9), 1   ;;  %s1468_s10 = smov (!%p142_p9), 127  }
  0x12   : > { %s1469_s11 = smov (!%p142_p9), 126   ;;  %s1470_s19 = smov (!%p142_p9), [#allocation2]  }
  0x13   : > { %v1461_v0 = vmov 0.0   ;;  %s2214_s24 = smov (!%p166_p10, %s1294_s24), 7  ;;  %vm314_vm0 = vcmask 1043456   ;;  %v174_v5 = vld [vmem:[%s2177_s1] sm:$0xff]  ;;  %vm283_vm1 = vcmask 31744   ;;  %v175_v6 = vld [vmem:[%s2177_s1 + $0x8] sm:$0xff] }
  0x14   : > { %387 = vmatprep.mubr.f32.mxu0 %v1461_v0  ;;  %512 = vmatprep.mubr.f32.mxu1 %v1461_v0  ;;  %s1295_s25 = sshll.u32 %s2214_s24, 2  ;;  %v176_v7 = vld [vmem:[%s2177_s1 + $0x10] sm:$0xff]  ;;  %v177_v8 = vld [vmem:[%s2177_s1 + $0x18] sm:$0xff]  ;;  %v178_v9 = vld [vmem:[%s2177_s1 + $0x20] sm:$0xff]  ;;  %s1403_s20 = sshll.u32 %s1470_s19, 4  ;;  %s1404_s20 = int_to_ptr.vmem [resolvable:$false] %s1403_s20 }
  0x15   : > { %s169_s28 = scalar_lea.vmem %s2176_s0, %s1295_s25  ;;  %v179_v10 = vld [vmem:[%s2177_s1 + $0x28] sm:$0xff]  ;;  %v180_v11 = vld [vmem:[%s2177_s1 + $0x30] sm:$0xff]  ;;  %v181_v12 = vld [vmem:[%s2177_s1 + $0x38] sm:$0xff]  ;;  %s1405_s24 = scalar_lea.vmem %s1404_s20, 3072 }
  0x16   : > { %v172_v1 = vld [vmem:[%s169_s28] sm:$0xff]  ;;  %v173_v2 = vld [vmem:[%s169_s28 + $0x8] sm:$0xff] }
  0x17   : > { %v281_v3 = vcombine.high %v172_v1, %v172_v1  ;;  %v282_v4 = vcombine.high %v173_v2, %v173_v2  ;;  %v182_v13 = vld [vmem:[%s2177_s1 + $0x40] sm:$0xff]  ;;  %v183_v14 = vld [vmem:[%s2177_s1 + $0x48] sm:$0xff] }
  0x19   : > { %1296 = vmatprep.subr.msk.mxu0 %vm314_vm0, %v281_v3  ;;  %1308 = vmatprep.subr.msk.mxu1 %vm314_vm0, %v282_v4  ;;  %v194_v4 = vlaneseq }
  0x1a   : > { %1297 = vmatpush1.msk.msra.mxu0 %vm314_vm0, %v172_v1  ;;  %1309 = vmatpush1.msk.msra.mxu1 %vm314_vm0, %v173_v2 }
  0x1b   : > { %1298 = vmatmul.mubr.msk.f32.vlgmr.msra.gmra.mxu0 %vm283_vm1, %v174_v5  ;;  %1310 = vmatmul.mubr.msk.f32.vlgmr.msra.gmra.mxu1 %vm283_vm1, %v174_v5 }
  0x1c   : > { %393 = vmatprep.mubr.f32.mxu0 %v1461_v0  ;;  %518 = vmatprep.mubr.f32.mxu1 %v1461_v0 }
  0x1f   : > { %1299 = vmatmul.mubr.msk.f32.gmra.mxu0 %vm283_vm1, %v175_v6  ;;  %1311 = vmatmul.mubr.msk.f32.gmra.mxu1 %vm283_vm1, %v175_v6 }
  0x20   : > { %399 = vmatprep.mubr.f32.mxu0 %v1461_v0  ;;  %524 = vmatprep.mubr.f32.mxu1 %v1461_v0 }
  0x23   : > { %1300 = vmatmul.mubr.msk.f32.gmra.mxu0 %vm283_vm1, %v176_v7  ;;  %1312 = vmatmul.mubr.msk.f32.gmra.mxu1 %vm283_vm1, %v176_v7  ;;  %v1678_v7 = vand.u32 127, %v194_v4 }
  0x24   : > { %405 = vmatprep.mubr.f32.mxu0 %v1461_v0  ;;  %530 = vmatprep.mubr.f32.mxu1 %v1461_v0 }
  0x25   : > { %vm2182_vm2 = vcmp.lt.s32.totalorder %v1678_v7, 20  ;;  %vm602_vm5 = vcmp.lt.s32.totalorder %v1678_v7, 10  ;;  %vm623_vm8 = vcmp.lt.s32.totalorder %v1678_v7, 118  ;;  %vm2187_vm11 = vcmp.lt.s32.totalorder %v1678_v7, 2 }
  0x26   : > { %vm690_vm13 = vcmp.lt.s32.totalorder %v1678_v7, 1  ;;  %vm711_vm0 = vcmp.lt.s32.totalorder %v1678_v7, 127 }
  0x27   : > { %1301 = vmatmul.mubr.msk.f32.gmra.mxu0 %vm283_vm1, %v177_v8  ;;  %1313 = vmatmul.mubr.msk.f32.gmra.mxu1 %vm283_vm1, %v177_v8 }
  0x28   : > { %411 = vmatprep.mubr.f32.mxu0 %v1461_v0  ;;  %536 = vmatprep.mubr.f32.mxu1 %v1461_v0 }
  0x2b   : > { %1302 = vmatmul.mubr.msk.f32.gmra.mxu0 %vm283_vm1, %v178_v9  ;;  %1314 = vmatmul.mubr.msk.f32.gmra.mxu1 %vm283_vm1, %v178_v9 }
  0x2c   : > { %417 = vmatprep.mubr.f32.mxu0 %v1461_v0  ;;  %542 = vmatprep.mubr.f32.mxu1 %v1461_v0 }
  0x2f   : > { %1303 = vmatmul.mubr.msk.f32.gmra.mxu0 %vm283_vm1, %v179_v10  ;;  %1315 = vmatmul.mubr.msk.f32.gmra.mxu1 %vm283_vm1, %v179_v10  ;;  %v197_v10 = vadd.s32 256, %v1678_v7 }
  0x30   : > { %423 = vmatprep.mubr.f32.mxu0 %v1461_v0  ;;  %548 = vmatprep.mubr.f32.mxu1 %v1461_v0 }
  0x33   : > { %1304 = vmatmul.mubr.msk.f32.gmra.mxu0 %vm283_vm1, %v180_v11  ;;  %1316 = vmatmul.mubr.msk.f32.gmra.mxu1 %vm283_vm1, %v180_v11 }
  0x34   : > { %429 = vmatprep.mubr.f32.mxu0 %v1461_v0  ;;  %554 = vmatprep.mubr.f32.mxu1 %v1461_v0 }
  0x37   : > { %1305 = vmatmul.mubr.msk.f32.gmra.mxu0 %vm283_vm1, %v181_v12  ;;  %1317 = vmatmul.mubr.msk.f32.gmra.mxu1 %vm283_vm1, %v181_v12  ;;  %v196_v12 = vadd.s32 128, %v1678_v7 }
  0x38   : > { %435 = vmatprep.mubr.f32.mxu0 %v1461_v0  ;;  %560 = vmatprep.mubr.f32.mxu1 %v1461_v0 }
  0x3b   : > { %1306 = vmatmul.mubr.msk.f32.gmra.mxu0 %vm283_vm1, %v182_v13  ;;  %1318 = vmatmul.mubr.msk.f32.gmra.mxu1 %vm283_vm1, %v182_v13 }
  0x3c   : > { %441 = vmatprep.mubr.f32.mxu0 %v1461_v0  ;;  %566 = vmatprep.mubr.f32.mxu1 %v1461_v0 }
  0x3f   : > { %1307 = vmatmul.mubr.msk.f32.gmra.mxu0 %vm283_vm1, %v183_v14  ;;  %1319 = vmatmul.mubr.msk.f32.gmra.mxu1 %vm283_vm1, %v183_v14  ;;  %v1690_v14 = vand.u32 255, %v197_v10 }
  0x40   : > { %844 = vmatprep.mubr.f32.mxu0 %v1461_v0  ;;  %969 = vmatprep.mubr.f32.mxu1 %v1461_v0 }
  0x41   : > { %vm2180_vm3 = vcmp.ge.s32.totalorder %v1690_v14, 20  ;;  %vm2183_vm6 = vcmp.ge.s32.totalorder %v1690_v14, 10  ;;  %vm2186_vm10 = vcmp.ge.s32.totalorder %v1690_v14, 2 }
  0xdb   : > { %v389_v15 = vpop.f32.mrf.mxu0  ;;  %v514_v16 = vpop.f32.mrf.mxu1 }
  0xdc   : > { %573 = vrot.lane.b32.xlu0 %v389_v15, %s1462_s4  ;;  %v1693_v15 = vand.u32 255, %v1678_v7 }
  0xdd   : > { %v391_v17 = vpop.f32.mrf.mxu0  ;;  %v516_v18 = vpop.f32.mrf.mxu1 }
  0xde   : > { %575 = vrot.lane.b32.xlu1 %v391_v17, %s1462_s4  ;;  %v1697_v17 = vand.u32 255, %v196_v12  ;;  %vm2181_vm4 = vcmp.ge.s32.totalorder %v1693_v15, 20  ;;  %vm251_vm7 = vcmp.ge.s32.totalorder %v1693_v15, 10  ;;  %vm2184_vm12 = vcmp.ge.s32.totalorder %v1693_v15, 2 }
  0xdf   : > { %v395_v19 = vpop.f32.mrf.mxu0  ;;  %v520_v20 = vpop.f32.mrf.mxu1  ;;  %vm2185_vm15 = vcmp.ge.s32.totalorder %v1693_v15, 1 }
  0xe0   : > { %577 = vrot.lane.b32.xlu0 %v514_v16, %s1462_s4  ;;  %vm272_vm9 = vcmp.lt.s32.totalorder %v1697_v17, 246  ;;  %vm264_vm1 = vcmp.lt.s32.totalorder %v1697_v17, 255 }
  0xe1   : > { %v397_v21 = vpop.f32.mrf.mxu0  ;;  %v522_v22 = vpop.f32.mrf.mxu1 }
  0xe2   : > { %579 = vrot.lane.b32.xlu1 %v516_v18, %s1462_s4  ;;  %v198_v18 = vadd.s32 384, %v1678_v7 }
  0xe3   : > { %v1622_v23 = vpop.f32.mrf.mxu0  ;;  %v1624_v24 = vpop.f32.mrf.mxu1 }
  0xe4   : > { %594 = vrot.lane.b32.xlu0 %v395_v19, %s1463_s5 }
  0xe5   : > { %v1627_v25 = vpop.f32.mrf.mxu0  ;;  %v1629_v26 = vpop.f32.mrf.mxu1 }
  0xe6   : > { %596 = vrot.lane.b32.xlu1 %v397_v21, %s1463_s5 }
  0xe7   : > { %v407_v27 = vpop.f32.mrf.mxu0  ;;  %v532_v28 = vpop.f32.mrf.mxu1 }
  0xe8   : > { %598 = vrot.lane.b32.xlu0 %v520_v20, %s1463_s5 }
  0xe9   : > { %v409_v29 = vpop.f32.mrf.mxu0  ;;  %v534_v30 = vpop.f32.mrf.mxu1 }
  0xea   : > { %600 = vrot.lane.b32.xlu1 %v522_v22, %s1463_s5  ;;  %v1714_v22 = vand.u32 255, %v198_v18 }
  0xeb   : > { %v413_v31 = vpop.f32.mrf.mxu0  ;;  %v538_v32 = vpop.f32.mrf.mxu1 }
  0xec   : > { %615 = vrot.lane.b32.xlu0 %v407_v27, %s1464_s6  ;;  %vm266_vm14 = vcmp.lt.s32.totalorder %v1714_v22, 255 }
  0xed   : > { %v415_v33 = vpop.f32.mrf.mxu0  ;;  %v540_v35 = vpop.f32.mrf.mxu1 }
  0xee   : > { %617 = vrot.lane.b32.xlu1 %v409_v29, %s1464_s6 }
  0xef   : > { %v419_v34 = vpop.f32.mrf.mxu0  ;;  %v544_v37 = vpop.f32.mrf.mxu1 }
  0xf0   : > { %619 = vrot.lane.b32.xlu0 %v532_v28, %s1464_s6 }
  0xf1   : > { %v421_v36 = vpop.f32.mrf.mxu0  ;;  %v546_v39 = vpop.f32.mrf.mxu1 }
  0xf2   : > { %621 = vrot.lane.b32.xlu1 %v534_v30, %s1464_s6 }
  0xf3   : > { %v425_v38 = vpop.f32.mrf.mxu0  ;;  %v550_v41 = vpop.f32.mrf.mxu1 }
  0xf4   : > { %636 = vrot.lane.b32.xlu0 %v413_v31, %s1465_s7 }
  0xf5   : > { %v427_v40 = vpop.f32.mrf.mxu0  ;;  %v552_v43 = vpop.f32.mrf.mxu1 }
  0xf6   : > { %638 = vrot.lane.b32.xlu1 %v415_v33, %s1465_s7 }
  0xf7   : > { %v1643_v42 = vpop.f32.mrf.mxu0  ;;  %v1649_v45 = vpop.f32.mrf.mxu1 }
  0xf8   : > { %661 = vrot.lane.b32.xlu0 %v419_v34, %s1466_s8 }
  0xf9   : > { %v1647_v44 = vpop.f32.mrf.mxu0  ;;  %v1653_v47 = vpop.f32.mrf.mxu1 }
  0xfa   : > { %665 = vrot.lane.b32.xlu1 %v544_v37, %s1466_s8 }
  0xfb   : > { %v437_v46 = vpop.f32.mrf.mxu0  ;;  %v562_v49 = vpop.f32.mrf.mxu1 }
  0xfc   : > { %663 = vrot.lane.b32.xlu0 %v421_v36, %s1466_s8 }
  0xfd   : > { %v439_v48 = vpop.f32.mrf.mxu0  ;;  %v564_v50 = vpop.f32.mrf.mxu1 }
  0xfe   : > { %667 = vrot.lane.b32.xlu1 %v546_v39, %s1466_s8 }
  0xff   : > { %v443_v51 = vpop.f32.mrf.mxu0  ;;  %v568_v53 = vpop.f32.mrf.mxu1 }
 0x100   : > { %682 = vrot.lane.b32.xlu0 %v425_v38, %s1467_s9 }
 0x101   : > { %v445_v52 = vpop.f32.mrf.mxu0  ;;  %v570_v54 = vpop.f32.mrf.mxu1 }
 0x102   : > { %684 = vrot.lane.b32.xlu1 %v427_v40, %s1467_s9 }
 0x104   : > { %686 = vrot.lane.b32.xlu0 %v550_v41, %s1467_s9 }
 0x106   : > { %688 = vrot.lane.b32.xlu1 %v552_v43, %s1467_s9 }
 0x108   : > { %703 = vrot.lane.b32.xlu0 %v437_v46, %s1468_s10 }
 0x10a   : > { %705 = vrot.lane.b32.xlu1 %v439_v48, %s1468_s10 }
 0x10c   : > { %707 = vrot.lane.b32.xlu0 %v562_v49, %s1468_s10 }
 0x10e   : > { %709 = vrot.lane.b32.xlu1 %v564_v50, %s1468_s10 }
 0x110   : > { %724 = vrot.lane.b32.xlu0 %v443_v51, %s1469_s11 }
 0x112   : > { %726 = vrot.lane.b32.xlu1 %v445_v52, %s1469_s11 }
 0x114   : > { %728 = vrot.lane.b32.xlu0 %v568_v53, %s1469_s11 }
 0x116   : > { %730 = vrot.lane.b32.xlu1 %v570_v54, %s1469_s11 }
 0x118   : > { %640 = vrot.lane.b32.xlu0 %v538_v32, %s1465_s7 }
 0x11a   : > { %642 = vrot.lane.b32.xlu1 %v540_v35, %s1465_s7 }
 0x14e   : > { %v574_v55 = vpop.permute.xlu0 %573 }
 0x150   : > { %v576_v56 = vpop.permute.xlu1 %575 }
 0x151   : > { %v584_v30 = vsel %vm2182_vm2, %v574_v55, %v576_v56 }
 0x152   : > { %v578_v57 = vpop.permute.xlu0 %577  ;;  %v591_v41 = vadd.f32 %v584_v30, %v1627_v25 }
 0x153   : > { %v583_v21 = vsel %vm2182_vm2, %v576_v56, %v578_v57 }
 0x154   : > { %v580_v58 = vpop.permute.xlu1 %579  ;;  %v588_v31 = vsel %vm2180_vm3, %v583_v21, 0.0  ;;  %vm274_vm3 = vcmp.lt.s32.totalorder %v1714_v22, 246 }
 0x155   : > { %v585_v27 = vsel %vm2182_vm2, %v580_v58, %v574_v55  ;;  %v582_v34 = vsel %vm2182_vm2, %v578_v57, %v580_v58  ;;  %v592_v43 = vadd.f32 %v588_v31, %v1624_v24  ;;  %vm644_vm2 = vcmp.lt.s32.totalorder %v1678_v7, 108 }
 0x156   : > { %v595_v59 = vpop.permute.xlu0 %594  ;;  %v586_v35 = vsel %vm2181_vm4, %v585_v27, 0.0  ;;  %vm732_vm4 = vcmp.lt.s32.totalorder %v1678_v7, 126  ;;  %v593_v50 = vadd.f32 %v582_v34, %v1629_v26 }
 0x157   : > { %v590_v49 = vadd.f32 %v586_v35, %v1622_v23 }
 0x158   : > { %v597_v60 = vpop.permute.xlu1 %596 }
 0x159   : > { %v605_v37 = vsel %vm602_vm5, %v595_v59, %v597_v60 }
 0x15a   : > { %v599_v61 = vpop.permute.xlu0 %598  ;;  %v612_v52 = vadd.f32 %v605_v37, %v591_v41 }
 0x15b   : > { %v604_v29 = vsel %vm602_vm5, %v597_v60, %v599_v61 }
 0x15c   : > { %v601_v62 = vpop.permute.xlu1 %600  ;;  %v609_v38 = vsel %vm2183_vm6, %v604_v29, 0.0  ;;  %vm2189_vm6 = vcmp.lt.s32.totalorder %v1697_v17, 254 }
 0x15d   : > { %v606_v36 = vsel %vm602_vm5, %v601_v62, %v595_v59  ;;  %v603_v46 = vsel %vm602_vm5, %v599_v61, %v601_v62  ;;  %v613_v53 = vadd.f32 %v609_v38, %v592_v43 }
 0x15e   : > { %v1666_v63 = vpop.permute.xlu0 %615  ;;  %v607_v51 = vsel %vm251_vm7, %v606_v36, 0.0  ;;  %v614_v26 = vadd.f32 %v603_v46, %v593_v50 }
 0x15f   : > { %v611_v59 = vadd.f32 %v607_v51, %v590_v49 }
 0x160   : > { %v1668_v1 = vpop.permute.xlu1 %617 }
 0x161   : > { %v626_v60 = vsel %vm623_vm8, %v1666_v63, %v1668_v1 }
 0x162   : > { %v1670_v2 = vpop.permute.xlu0 %619  ;;  %v632_v46 = vadd.f32 %v626_v60, %v611_v59 }
 0x163   : > { %v625_v54 = vsel %vm623_vm8, %v1668_v1, %v1670_v2 }
 0x164   : > { %v1672_v3 = vpop.permute.xlu1 %621 }
 0x166   : > { %v1674_v5 = vpop.permute.xlu0 %636 }
 0x168   : > { %v1676_v6 = vpop.permute.xlu1 %638 }
 0x169   : > { %v647_v36 = vsel %vm644_vm2, %v1674_v5, %v1676_v6 }
 0x16a   : > { %v1680_v8 = vpop.permute.xlu0 %661 }
 0x16c   : > { %v1682_v9 = vpop.permute.xlu1 %665 }
 0x16e   : > { %v1685_v11 = vpop.permute.xlu0 %663 }
 0x16f   : > { %v671_v24 = vsel %vm2187_vm11, %v1685_v11, %v1682_v9  ;;  %v672_v55 = vsel %vm2187_vm11, %v1680_v8, %v1685_v11 }
 0x170   : > { %v1688_v13 = vpop.permute.xlu1 %667  ;;  %v676_v61 = vsel %vm2186_vm10, %v671_v24, 0.0  ;;  %v679_v11 = vadd.f32 %v672_v55, %v1647_v44  ;;  %vm2192_vm10 = vcmp.ge.s32.totalorder %v1690_v14, 1 }
 0x171   : > { %v673_v32 = vsel %vm2187_vm11, %v1688_v13, %v1680_v8  ;;  %v670_v4 = vsel %vm2187_vm11, %v1682_v9, %v1688_v13  ;;  %vm278_vm11 = vcmp.lt.s32.totalorder %v1714_v22, 236  ;;  %v627_v9 = vsel %vm623_vm8, %v1672_v3, %v1666_v63 }
 0x172   : > { %v1695_v16 = vpop.permute.xlu0 %682  ;;  %v674_v48 = vsel %vm2184_vm12, %v673_v32, 0.0  ;;  %vm2188_vm12 = vcmp.lt.s32.totalorder %v1714_v22, 254  ;;  %v680_v13 = vadd.f32 %v676_v61, %v1649_v45  ;;  %v681_v27 = vadd.f32 %v670_v4, %v1653_v47 }
 0x173   : > { %v678_v56 = vadd.f32 %v674_v48, %v1643_v42  ;;  %v629_v42 = vsel %vm272_vm9, %v625_v54, 0.0  ;;  %v624_v45 = vsel %vm623_vm8, %v1670_v2, %v1672_v3  ;;  %v631_v47 = vsel %vm274_vm3, %v627_v9, 0.0  ;;  %v189_v9 = vld [vmem:[%s2178_s2 + $0x28] sm:$0xff] }
 0x174   : > { %v1700_v19 = vpop.permute.xlu1 %684  ;;  %v633_v48 = vadd.f32 %v629_v42, %v612_v52  ;;  %v634_v24 = vadd.f32 %v624_v45, %v613_v53  ;;  %v635_v55 = vadd.f32 %v631_v47, %v614_v26 }
 0x175   : > { %v693_v1 = vsel %vm690_vm13, %v1695_v16, %v1700_v19 }
 0x176   : > { %v1709_v20 = vpop.permute.xlu0 %686  ;;  %v700_v29 = vadd.f32 %v693_v1, %v679_v11  ;;  %v185_v11 = vld [vmem:[%s2178_s2 + $0x8] sm:$0xff] }
 0x177   : > { %v692_v57 = vsel %vm690_vm13, %v1700_v19, %v1709_v20 }
 0x178   : > { %v689_v28 = vpop.permute.xlu1 %688  ;;  %v697_v12 = vsel %vm2192_vm10, %v692_v57, 0.0  ;;  %vm749_vm10 = vcmask 130048  }
 0x179   : > { %v694_v39 = vsel %vm690_vm13, %v689_v28, %v1695_v16  ;;  %v691_v44 = vsel %vm690_vm13, %v1709_v20, %v689_v28  ;;  %v701_v63 = vadd.f32 %v697_v12, %v680_v13  ;;  %v186_v12 = vld [vmem:[%s2178_s2 + $0x10] sm:$0xff] }
 0x17a   : > { %v704_v33 = vpop.permute.xlu0 %703  ;;  %v695_v23 = vsel %vm2185_vm15, %v694_v39, 0.0  ;;  %vm276_vm15 = vcmp.lt.s32.totalorder %v1697_v17, 236  ;;  %v190_v13 = vld [vmem:[%s2178_s2 + $0x30] sm:$0xff] }
 0x17b   : > { %v699_v8 = vadd.f32 %v695_v23, %v678_v56  ;;  %v653_v56 = vadd.f32 %v647_v36, %v632_v46 }
 0x17c   : > { %v706_v40 = vpop.permute.xlu1 %705 }
 0x17d   : > { %v714_v18 = vsel %vm711_vm0, %v704_v33, %v706_v40  ;;  %v657_v1 = vmax.f32 %v653_v56, 0.0 }
 0x17e   : > { %v708_v25 = vpop.permute.xlu0 %707  ;;  %v720_v20 = vadd.f32 %v714_v18, %v699_v8  ;;  %v184_v8 = vld [vmem:[%s2178_s2] sm:$0xff]  ;;  %v187_v18 = vld [vmem:[%s2178_s2 + $0x18] sm:$0xff] }
 0x17f   : > { %v713_v62 = vsel %vm711_vm0, %v706_v40, %v708_v25 }
 0x180   : > { %v710_v58 = vpop.permute.xlu1 %709  ;;  %v717_v16 = vsel %vm264_vm1, %v713_v62, 0.0 }
 0x181   : > { %v715_v21 = vsel %vm711_vm0, %v710_v58, %v704_v33  ;;  %v712_v30 = vsel %vm711_vm0, %v708_v25, %v710_v58  ;;  %v702_v33 = vadd.f32 %v691_v44, %v681_v27  ;;  %v721_v34 = vadd.f32 %v717_v16, %v700_v29  ;;  %v191_v44 = vld [vmem:[%s2178_s2 + $0x38] sm:$0xff]  ;;  %v192_v16 = vld [vmem:[%s2178_s2 + $0x40] sm:$0xff] }
 0x182   : > { %v725_v10 = vpop.permute.xlu0 %724  ;;  %v719_v28 = vsel %vm266_vm14, %v715_v21, 0.0  ;;  %v722_v2 = vadd.f32 %v712_v30, %v701_v63  ;;  %v188_v21 = vld [vmem:[%s2178_s2 + $0x20] sm:$0xff] }
 0x183   : > { %v723_v39 = vadd.f32 %v719_v28, %v702_v33 }
 0x184   : > { %v727_v19 = vpop.permute.xlu1 %726 }
 0x185   : > { %v735_v31 = vsel %vm732_vm4, %v725_v10, %v727_v19 }
 0x186   : > { %v729_v32 = vpop.permute.xlu0 %728  ;;  %v741_v3 = vadd.f32 %v735_v31, %v720_v20 }
 0x187   : > { %v734_v35 = vsel %vm732_vm4, %v727_v19, %v729_v32  ;;  %v193_v19 = vld [vmem:[%s2178_s2 + $0x48] sm:$0xff] }
 0x188   : > { %v738_v37 = vsel %vm2189_vm6, %v734_v35, 0.0  ;;  %v731_v38 = vpop.permute.xlu1 %730  ;;  %v745_v57 = vmax.f32 %v741_v3, 0.0 }
 0x189   : > { %v742_v40 = vadd.f32 %v738_v37, %v721_v34  ;;  %v733_v41 = vsel %vm732_vm4, %v729_v32, %v731_v38  ;;  %v736_v43 = vsel %vm732_vm4, %v731_v38, %v725_v10 }
 0x18a   : > { %v740_v49 = vsel %vm2188_vm12, %v736_v43, 0.0  ;;  %v743_v50 = vadd.f32 %v733_v41, %v722_v2  ;;  %v641_v51 = vpop.permute.xlu0 %640  ;;  %vm2194_vm12 = vcmp.ge.s32.totalorder %v1693_v15, 20 }
 0x18b   : > { %v744_v25 = vadd.f32 %v740_v49, %v723_v39  ;;  %v646_v54 = vsel %vm644_vm2, %v1676_v6, %v641_v51  ;;  %v746_v23 = vmax.f32 %v742_v40, 0.0 }
 0x18c   : > { %v650_v58 = vsel %vm276_vm15, %v646_v54, 0.0  ;;  %v643_v59 = vpop.permute.xlu1 %642  ;;  %v747_v62 = vmax.f32 %v743_v50, 0.0 }
 0x18d   : > { %v654_v52 = vadd.f32 %v650_v58, %v633_v48  ;;  %v645_v60 = vsel %vm644_vm2, %v641_v51, %v643_v59  ;;  %v648_v53 = vsel %vm644_vm2, %v643_v59, %v1674_v5  ;;  %808 = vmatprep.subr.mxu0 %v746_v23  ;;  %v748_v61 = vmax.f32 %v744_v25, 0.0 }
 0x18e   : > { %v652_v6 = vsel %vm278_vm11, %v648_v53, 0.0  ;;  %v655_v26 = vadd.f32 %v645_v60, %v634_v24  ;;  %809 = vmatpush1.msra.mxu0 %v745_v57 }
 0x18f   : > { %v656_v42 = vadd.f32 %v652_v6, %v635_v55  ;;  %933 = vmatprep.subr.mxu1 %v748_v61  ;;  %v658_v4 = vmax.f32 %v654_v52, 0.0 }
 0x190   : > { %934 = vmatpush1.msra.mxu1 %v747_v62  ;;  %v659_v10 = vmax.f32 %v655_v26, 0.0 }
 0x191   : > { %810 = vmatprep.subr.mxu0 %v658_v4  ;;  %v660_v5 = vmax.f32 %v656_v42, 0.0 }
 0x192   : > { %811 = vmatpush1.msra.mxu0 %v657_v1 }
 0x193   : > { %1320 = vmatmul.mubr.msk.f32.vlgmr.msra.gmra.mxu0 %vm749_vm10, %v184_v8  ;;  %935 = vmatprep.subr.mxu1 %v660_v5 }
 0x194   : > { %936 = vmatpush1.msra.mxu1 %v659_v10  ;;  %850 = vmatprep.mubr.f32.mxu0 %v1461_v0 }
 0x195   : > { %1330 = vmatmul.mubr.msk.f32.vlgmr.msra.gmra.mxu1 %vm749_vm10, %v184_v8 }
 0x196   : > { %975 = vmatprep.mubr.f32.mxu1 %v1461_v0 }
 0x197   : > { %1321 = vmatmul.mubr.msk.f32.gmra.mxu0 %vm749_vm10, %v185_v11 }
 0x198   : > { %856 = vmatprep.mubr.f32.mxu0 %v1461_v0 }
 0x199   : > { %1331 = vmatmul.mubr.msk.f32.gmra.mxu1 %vm749_vm10, %v185_v11 }
 0x19a   : > { %981 = vmatprep.mubr.f32.mxu1 %v1461_v0 }
 0x19b   : > { %1322 = vmatmul.mubr.msk.f32.gmra.mxu0 %vm749_vm10, %v186_v12 }
 0x19c   : > { %862 = vmatprep.mubr.f32.mxu0 %v1461_v0 }
 0x19d   : > { %1332 = vmatmul.mubr.msk.f32.gmra.mxu1 %vm749_vm10, %v186_v12 }
 0x19e   : > { %987 = vmatprep.mubr.f32.mxu1 %v1461_v0 }
 0x19f   : > { %1323 = vmatmul.mubr.msk.f32.gmra.mxu0 %vm749_vm10, %v187_v18 }
 0x1a0   : > { %868 = vmatprep.mubr.f32.mxu0 %v1461_v0 }
 0x1a1   : > { %1333 = vmatmul.mubr.msk.f32.gmra.mxu1 %vm749_vm10, %v187_v18 }
 0x1a2   : > { %993 = vmatprep.mubr.f32.mxu1 %v1461_v0 }
 0x1a3   : > { %1324 = vmatmul.mubr.msk.f32.gmra.mxu0 %vm749_vm10, %v188_v21 }
 0x1a4   : > { %874 = vmatprep.mubr.f32.mxu0 %v1461_v0 }
 0x1a5   : > { %1334 = vmatmul.mubr.msk.f32.gmra.mxu1 %vm749_vm10, %v188_v21 }
 0x1a6   : > { %999 = vmatprep.mubr.f32.mxu1 %v1461_v0 }
 0x1a7   : > { %1325 = vmatmul.mubr.msk.f32.gmra.mxu0 %vm749_vm10, %v189_v9 }
 0x1a8   : > { %880 = vmatprep.mubr.f32.mxu0 %v1461_v0 }
 0x1a9   : > { %1335 = vmatmul.mubr.msk.f32.gmra.mxu1 %vm749_vm10, %v189_v9 }
 0x1aa   : > { %1005 = vmatprep.mubr.f32.mxu1 %v1461_v0 }
 0x1ab   : > { %1326 = vmatmul.mubr.msk.f32.gmra.mxu0 %vm749_vm10, %v190_v13 }
 0x1ac   : > { %886 = vmatprep.mubr.f32.mxu0 %v1461_v0 }
 0x1ad   : > { %1336 = vmatmul.mubr.msk.f32.gmra.mxu1 %vm749_vm10, %v190_v13 }
 0x1ae   : > { %1011 = vmatprep.mubr.f32.mxu1 %v1461_v0 }
 0x1af   : > { %1327 = vmatmul.mubr.msk.f32.gmra.mxu0 %vm749_vm10, %v191_v44 }
 0x1b0   : > { %892 = vmatprep.mubr.f32.mxu0 %v1461_v0 }
 0x1b1   : > { %1337 = vmatmul.mubr.msk.f32.gmra.mxu1 %vm749_vm10, %v191_v44 }
 0x1b2   : > { %1017 = vmatprep.mubr.f32.mxu1 %v1461_v0 }
 0x1b3   : > { %1328 = vmatmul.mubr.msk.f32.gmra.mxu0 %vm749_vm10, %v192_v16 }
 0x1b4   : > { %898 = vmatprep.mubr.f32.mxu0 %v1461_v0 }
 0x1b5   : > { %1338 = vmatmul.mubr.msk.f32.gmra.mxu1 %vm749_vm10, %v192_v16 }
 0x1b6   : > { %1023 = vmatprep.mubr.f32.mxu1 %v1461_v0 }
 0x1b7   : > { %1329 = vmatmul.mubr.msk.f32.gmra.mxu0 %vm749_vm10, %v193_v19 }
 0x1b9   : > { %1339 = vmatmul.mubr.msk.f32.gmra.mxu1 %vm749_vm10, %v193_v19  ;;  %vm2193_vm10 = vcmp.lt.s32.totalorder %v1678_v7, 20 }
 0x1ba   : > { %vm2195_vm6 = vmmov %vm2193_vm10 }
 0x253   : > { %v846_v27 = vpop.f32.mrf.mxu0 }
 0x254   : > { %1030 = vrot.lane.b32.xlu0 %v846_v27, %s1462_s4 }
 0x255   : > { %v848_v29 = vpop.f32.mrf.mxu0  ;;  %v971_v30 = vpop.f32.mrf.mxu1 }
 0x256   : > { %1032 = vrot.lane.b32.xlu1 %v848_v29, %s1462_s4 }
 0x257   : > { %v973_v31 = vpop.f32.mrf.mxu1  ;;  %v852_v45 = vpop.f32.mrf.mxu0 }
 0x258   : > { %1034 = vrot.lane.b32.xlu0 %v971_v30, %s1462_s4 }
 0x259   : > { %v854_v63 = vpop.f32.mrf.mxu0  ;;  %v977_v20 = vpop.f32.mrf.mxu1 }
 0x25a   : > { %1036 = vrot.lane.b32.xlu1 %v973_v31, %s1462_s4  ;;  %s162_s4 = sand.u32 1, %s1451_s13  }
 0x25b   : > { %v1932_v0 = vpop.f32.mrf.mxu0  ;;  %v979_v28 = vpop.f32.mrf.mxu1 }
 0x25c   : > { %1050 = vrot.lane.b32.xlu0 %v852_v45, %s1463_s5 }
 0x25d   : > { %v1935_v32 = vpop.f32.mrf.mxu0  ;;  %v1937_v47 = vpop.f32.mrf.mxu1 }
 0x25e   : > { %1052 = vrot.lane.b32.xlu1 %v854_v63, %s1463_s5 }
 0x25f   : > { %v864_v33 = vpop.f32.mrf.mxu0  ;;  %v1940_v34 = vpop.f32.mrf.mxu1 }
 0x260   : > { %1054 = vrot.lane.b32.xlu0 %v977_v20, %s1463_s5 }
 0x261   : > { %v866_v35 = vpop.f32.mrf.mxu0  ;;  %v989_v36 = vpop.f32.mrf.mxu1 }
 0x262   : > { %1056 = vrot.lane.b32.xlu1 %v979_v28, %s1463_s5  ;;  %s1345_s5 = smul.u32 96, %s162_s4 }
 0x263   : > { %v870_v2 = vpop.f32.mrf.mxu0  ;;  %v991_v3 = vpop.f32.mrf.mxu1 }
 0x264   : > { %1070 = vrot.lane.b32.xlu0 %v864_v33, %s1464_s6 }
 0x265   : > { %v872_v37 = vpop.f32.mrf.mxu0  ;;  %v995_v38 = vpop.f32.mrf.mxu1 }
 0x266   : > { %1072 = vrot.lane.b32.xlu1 %v866_v35, %s1464_s6 }
 0x267   : > { %v876_v39 = vpop.f32.mrf.mxu0  ;;  %v997_v40 = vpop.f32.mrf.mxu1 }
 0x268   : > { %1074 = vrot.lane.b32.xlu0 %v989_v36, %s1464_s6 }
 0x269   : > { %v878_v41 = vpop.f32.mrf.mxu0  ;;  %v1001_v43 = vpop.f32.mrf.mxu1 }
 0x26a   : > { %1076 = vrot.lane.b32.xlu1 %v991_v3, %s1464_s6  ;;  %s2034_s6 = scalar_lea.vmem [#allocation2], %s1345_s5 }
 0x26b   : > { %v882_v46 = vpop.f32.mrf.mxu0  ;;  %v1003_v48 = vpop.f32.mrf.mxu1 }
 0x26c   : > { %1090 = vrot.lane.b32.xlu0 %v870_v2, %s1465_s7 }
 0x26d   : > { %v884_v49 = vpop.f32.mrf.mxu0  ;;  %v1007_v50 = vpop.f32.mrf.mxu1 }
 0x26e   : > { %1092 = vrot.lane.b32.xlu1 %v872_v37, %s1465_s7 }
 0x26f   : > { %v1955_v51 = vpop.f32.mrf.mxu0  ;;  %v1009_v24 = vpop.f32.mrf.mxu1 }
 0x270   : > { %1094 = vrot.lane.b32.xlu0 %v995_v38, %s1465_s7 }
 0x271   : > { %v1959_v25 = vpop.f32.mrf.mxu0  ;;  %v1961_v54 = vpop.f32.mrf.mxu1 }
 0x272   : > { %1096 = vrot.lane.b32.xlu1 %v997_v40, %s1465_s7  ;;  %s1344_s7 = sshll.u32 %s1515_s16, 9  ;;  %s2136_s16 = scalar_lea.sflag [#allocation3], %s162_s4 }
 0x273   : > { %v894_v23 = vpop.f32.mrf.mxu0  ;;  %v1965_v55 = vpop.f32.mrf.mxu1 }
 0x274   : > { %1114 = vrot.lane.b32.xlu0 %v876_v39, %s1466_s8 }
 0x275   : > { %v896_v56 = vpop.f32.mrf.mxu0  ;;  %v1019_v57 = vpop.f32.mrf.mxu1 }
 0x276   : > { %1116 = vrot.lane.b32.xlu1 %v878_v41, %s1466_s8 }
 0x277   : > { %v1021_v58 = vpop.f32.mrf.mxu1  ;;  %v900_v59 = vpop.f32.mrf.mxu0 }
 0x278   : > { %1118 = vrot.lane.b32.xlu0 %v1001_v43, %s1466_s8 }
 0x279   : > { %v902_v52 = vpop.f32.mrf.mxu0  ;;  %v1025_v60 = vpop.f32.mrf.mxu1 }
 0x27a   : > { %1120 = vrot.lane.b32.xlu1 %v1003_v48, %s1466_s8  ;;  %s1228_s8 = sshll.u32 %s2034_s6, 4  ;;  %s2126_s8 = int_to_ptr.vmem [resolvable:$true] %s1228_s8 }
 0x27b   : > { %v1027_v53 = vpop.f32.mrf.mxu1  ;;  %s1399_s17 = scalar_lea.vmem %s2126_s8, 1536  ;;  %p1406_p0 = scmp.lt.s32.totalorder %s2126_s8, %s1404_s20 }
 0x27c   : > { %1134 = vrot.lane.b32.xlu0 %v882_v46, %s1467_s9  ;;  %p1400_p11 = scmp.ne.s32.totalorder %s2126_s8, %s1399_s17  ;;  %p1407_p1 = scmp.lt.s32.totalorder %s1405_s24, %s1399_s17 }
 0x27e   : > { %1136 = vrot.lane.b32.xlu1 %v884_v49, %s1467_s9  ;;  %p1401_p12 = pnand %p1400_p11, %p1532_p5  ;;  %p1408_p2 = por %p1407_p1, %p1406_p0 }
 0x280   : > { %1138 = vrot.lane.b32.xlu0 %v1007_v50, %s1467_s9  ;;  %p1402_p13 = pneg %p1401_p12 }
 0x282   : > { %1140 = vrot.lane.b32.xlu1 %v1009_v24, %s1467_s9  ;;  %p1409_p3 = pnand %p1408_p2, %p1402_p13 }
 0x284   : > { %1154 = vrot.lane.b32.xlu0 %v894_v23, %s1468_s10 }
 0x286   : > { %1156 = vrot.lane.b32.xlu1 %v896_v56, %s1468_s10 }
 0x288   : > { %1158 = vrot.lane.b32.xlu0 %v1019_v57, %s1468_s10 }
 0x28a   : > { %1160 = vrot.lane.b32.xlu1 %v1021_v58, %s1468_s10 }
 0x28c   : > { %1174 = vrot.lane.b32.xlu0 %v900_v59, %s1469_s11 }
 0x28e   : > { %1176 = vrot.lane.b32.xlu1 %v902_v52, %s1469_s11 }
 0x290   : > { %1178 = vrot.lane.b32.xlu0 %v1025_v60, %s1469_s11 }
 0x292   : > { %1180 = vrot.lane.b32.xlu1 %v1027_v53, %s1469_s11  ;;  %s2121_s11 = scalar_lea.hbm %s2179_s3, %s1344_s7 }
 0x2c6   : > { %v1031_v61 = vpop.permute.xlu0 %1030 }
 0x2c8   : > { %v1033_v62 = vpop.permute.xlu1 %1032 }
 0x2ca   : > { %v1035_v6 = vpop.permute.xlu0 %1034 }
 0x2cb   : > { %v1039_v9 = vsel %vm2195_vm6, %v1033_v62, %v1035_v6 }
 0x2cc   : > { %v1037_v26 = vpop.permute.xlu1 %1036 }
 0x2cd   : > { %v1041_v8 = vsel %vm2193_vm10, %v1037_v26, %v1031_v61  ;;  %vm2196_vm10 = vmmov %vm2195_vm6  ;;  %v1038_v63 = vsel %vm2195_vm6, %v1035_v6, %v1037_v26 }
 0x2ce   : > { %v1051_v42 = vpop.permute.xlu0 %1050  ;;  %v1042_v12 = vsel %vm2194_vm12, %v1041_v8, 0.0  ;;  %v1040_v16 = vsel %vm2196_vm10, %v1031_v61, %v1033_v62  ;;  %vm2197_vm12 = vcmp.ge.s32.totalorder %v1690_v14, 20  ;;  %vm2206_vm10 = vcmp.ge.s32.totalorder %v1690_v14, 1 }
 0x2cf   : > { %v1046_v13 = vadd.f32 %v1042_v12, %v1932_v0  ;;  %v1044_v30 = vsel %vm2197_vm12, %v1039_v9, 0.0  ;;  %v1047_v28 = vadd.f32 %v1040_v16, %v1935_v32  ;;  %v1049_v32 = vadd.f32 %v1038_v63, %v1940_v34 }
 0x2d0   : > { %v1053_v4 = vpop.permute.xlu1 %1052  ;;  %v1048_v36 = vadd.f32 %v1044_v30, %v1937_v47 }
 0x2d1   : > { %v1060_v20 = vsel %vm602_vm5, %v1051_v42, %v1053_v4 }
 0x2d2   : > { %v1055_v1 = vpop.permute.xlu0 %1054  ;;  %v1067_v39 = vadd.f32 %v1060_v20, %v1047_v28 }
 0x2d3   : > { %v1059_v19 = vsel %vm602_vm5, %v1053_v4, %v1055_v1 }
 0x2d4   : > { %v1057_v5 = vpop.permute.xlu1 %1056 }
 0x2d5   : > { %v1061_v10 = vsel %vm602_vm5, %v1057_v5, %v1051_v42  ;;  %v1058_v2 = vsel %vm602_vm5, %v1055_v1, %v1057_v5  ;;  %vm2201_vm5 = vcmp.ge.s32.totalorder %v1693_v15, 1 }
 0x2d6   : > { %v1071_v11 = vpop.permute.xlu0 %1070  ;;  %v1062_v21 = vsel %vm251_vm7, %v1061_v10, 0.0  ;;  %vm2198_vm7 = vcmp.ge.s32.totalorder %v1690_v14, 10  ;;  %v1069_v49 = vadd.f32 %v1058_v2, %v1049_v32 }
 0x2d7   : > { %v1066_v27 = vadd.f32 %v1062_v21, %v1046_v13  ;;  %v1064_v33 = vsel %vm2198_vm7, %v1059_v19, 0.0 }
 0x2d8   : > { %v1073_v18 = vpop.permute.xlu1 %1072  ;;  %v1068_v43 = vadd.f32 %v1064_v33, %v1048_v36 }
 0x2d9   : > { %v1080_v31 = vsel %vm623_vm8, %v1071_v11, %v1073_v18 }
 0x2da   : > { %v1075_v44 = vpop.permute.xlu0 %1074  ;;  %v1086_v3 = vadd.f32 %v1080_v31, %v1066_v27 }
 0x2db   : > { %v1079_v45 = vsel %vm623_vm8, %v1073_v18, %v1075_v44 }
 0x2dc   : > { %v1077_v29 = vpop.permute.xlu1 %1076  ;;  %v1083_v37 = vsel %vm272_vm9, %v1079_v45, 0.0 }
 0x2dd   : > { %v1081_v35 = vsel %vm623_vm8, %v1077_v29, %v1071_v11  ;;  %v1078_v40 = vsel %vm623_vm8, %v1075_v44, %v1077_v29  ;;  %v1087_v50 = vadd.f32 %v1083_v37, %v1067_v39 }
 0x2de   : > { %v1091_v0 = vpop.permute.xlu0 %1090  ;;  %v1085_v47 = vsel %vm274_vm3, %v1081_v35, 0.0  ;;  %v1088_v34 = vadd.f32 %v1078_v40, %v1068_v43  ;;  %vm2200_vm3 = vcmp.ge.s32.totalorder %v1693_v15, 2 }
 0x2df   : > { %v1089_v58 = vadd.f32 %v1085_v47, %v1069_v49 }
 0x2e0   : > { %v1093_v38 = vpop.permute.xlu1 %1092 }
 0x2e1   : > { %v1100_v41 = vsel %vm644_vm2, %v1091_v0, %v1093_v38 }
 0x2e2   : > { %v2021_v46 = vadd.f32 %v1100_v41, %v1086_v3  ;;  %v1095_v48 = vpop.permute.xlu0 %1094 }
 0x2e3   : > { %v1099_v24 = vsel %vm644_vm2, %v1093_v38, %v1095_v48 }
 0x2e4   : > { %v1110_v23 = vmax.f32 %v2021_v46, 0.0  ;;  %v1103_v56 = vsel %vm276_vm15, %v1099_v24, 0.0  ;;  %v1097_v57 = vpop.permute.xlu1 %1096 }
 0x2e5   : > { %v2028_v59 = vadd.f32 %v1103_v56, %v1087_v50  ;;  %v1098_v52 = vsel %vm644_vm2, %v1095_v48, %v1097_v57  ;;  %v1101_v60 = vsel %vm644_vm2, %v1097_v57, %v1091_v0  ;;  %vm2199_vm2 = vcmp.lt.s32.totalorder %v1678_v7, 2 }
 0x2e6   : > { %1198 = vst [vmem:[%s2034_s6] sm:$0xff] %v1110_v23  ;;  %v1105_v53 = vsel %vm278_vm11, %v1101_v60, 0.0  ;;  %v2041_v61 = vadd.f32 %v1098_v52, %v1088_v34  ;;  %v1115_v62 = vpop.permute.xlu0 %1114  ;;  %vm2202_vm8 = vmmov %vm2199_vm2  ;;  %vm2204_vm11 = vcmp.ge.s32.totalorder %v1690_v14, 2 }
 0x2e7   : > { %v1111_v6 = vmax.f32 %v2028_v59, 0.0  ;;  %v2044_v26 = vadd.f32 %v1105_v53, %v1089_v58  ;;  %vm2203_vm9 = vmmov %vm2199_vm2 }
 0x2e8   : > { %v1112_v42 = vmax.f32 %v2041_v61, 0.0  ;;  %v1117_v4 = vpop.permute.xlu1 %1116  ;;  %vm2205_vm15 = vmmov %vm2199_vm2 }
 0x2e9   : > { %1199 = vst [vmem:[%s2034_s6 + $0x8] sm:$0xff] %v1111_v6  ;;  %v1113_v1 = vmax.f32 %v2044_v26, 0.0  ;;  %v1124_v31 = vsel %vm2203_vm9, %v1115_v62, %v1117_v4 }
 0x2ea   : > { %1200 = vst [vmem:[%s2034_s6 + $0x10] sm:$0xff] %v1112_v42  ;;  %v1119_v8 = vpop.permute.xlu0 %1118  ;;  %v1131_v36 = vadd.f32 %v1124_v31, %v1959_v25 }
 0x2eb   : > { %1201 = vst [vmem:[%s2034_s6 + $0x18] sm:$0xff] %v1113_v1  ;;  %v1123_v27 = vsel %vm2202_vm8, %v1117_v4, %v1119_v8 }
 0x2ec   : > { %v1121_v5 = vpop.permute.xlu1 %1120  ;;  %v1128_v0 = vsel %vm2204_vm11, %v1123_v27, 0.0 }
 0x2ed   : > { %v1125_v18 = vsel %vm2199_vm2, %v1121_v5, %v1115_v62  ;;  %v1132_v37 = vadd.f32 %v1128_v0, %v1961_v54 }
 0x2ee   : > { %v1135_v10 = vpop.permute.xlu0 %1134  ;;  %v1126_v44 = vsel %vm2200_vm3, %v1125_v18, 0.0 }
 0x2ef   : > { %v1130_v29 = vadd.f32 %v1126_v44, %v1955_v51  ;;  %v1122_v51 = vsel %vm2205_vm15, %v1119_v8, %v1121_v5 }
 0x2f0   : > { %v1137_v11 = vpop.permute.xlu1 %1136  ;;  %v1133_v41 = vadd.f32 %v1122_v51, %v1965_v55 }
 0x2f1   : > { %v1144_v33 = vsel %vm690_vm13, %v1135_v10, %v1137_v11 }
 0x2f2   : > { %v1139_v12 = vpop.permute.xlu0 %1138  ;;  %v1151_v43 = vadd.f32 %v1144_v33, %v1131_v36 }
 0x2f3   : > { %v1143_v45 = vsel %vm690_vm13, %v1137_v11, %v1139_v12 }
 0x2f4   : > { %v1141_v21 = vpop.permute.xlu1 %1140  ;;  %v1148_v2 = vsel %vm2206_vm10, %v1143_v45, 0.0 }
 0x2f5   : > { %v1145_v9 = vsel %vm690_vm13, %v1141_v21, %v1135_v10  ;;  %v1142_v38 = vsel %vm690_vm13, %v1139_v12, %v1141_v21  ;;  %v1152_v47 = vadd.f32 %v1148_v2, %v1132_v37  ;;  %vm2207_vm13 = vcmp.lt.s32.totalorder %v1697_v17, 254 }
 0x2f6   : > { %v1155_v13 = vpop.permute.xlu0 %1154  ;;  %v1146_v19 = vsel %vm2201_vm5, %v1145_v9, 0.0  ;;  %v1153_v50 = vadd.f32 %v1142_v38, %v1133_v41 }
 0x2f7   : > { %v1150_v63 = vadd.f32 %v1146_v19, %v1130_v29 }
 0x2f8   : > { %v1157_v16 = vpop.permute.xlu1 %1156 }
 0x2f9   : > { %v1164_v15 = vsel %vm711_vm0, %v1155_v13, %v1157_v16 }
 0x2fa   : > { %v1159_v30 = vpop.permute.xlu0 %1158  ;;  %v1170_v32 = vadd.f32 %v1164_v15, %v1150_v63 }
 0x2fb   : > { %v1163_v28 = vsel %vm711_vm0, %v1157_v16, %v1159_v30 }
 0x2fc   : > { %v1161_v20 = vpop.permute.xlu1 %1160  ;;  %v1167_v39 = vsel %vm264_vm1, %v1163_v28, 0.0 }
 0x2fd   : > { %v1165_v3 = vsel %vm711_vm0, %v1161_v20, %v1155_v13  ;;  %v1162_v14 = vsel %vm711_vm0, %v1159_v30, %v1161_v20  ;;  %v1171_v24 = vadd.f32 %v1167_v39, %v1151_v43 }
 0x2fe   : > { %v1175_v35 = vpop.permute.xlu0 %1174  ;;  %v1169_v54 = vsel %vm266_vm14, %v1165_v3, 0.0  ;;  %v1172_v34 = vadd.f32 %v1162_v14, %v1152_v47  ;;  %vm2208_vm14 = vcmp.lt.s32.totalorder %v1714_v22, 254 }
 0x2ff   : > { %v1173_v52 = vadd.f32 %v1169_v54, %v1153_v50 }
 0x300   : > { %v1177_v40 = vpop.permute.xlu1 %1176 }
 0x301   : > { %v1184_v25 = vsel %vm732_vm4, %v1175_v35, %v1177_v40 }
 0x302   : > { %v1190_v48 = vadd.f32 %v1184_v25, %v1170_v32  ;;  %v1179_v49 = vpop.permute.xlu0 %1178 }
 0x303   : > { %v1183_v55 = vsel %vm732_vm4, %v1177_v40, %v1179_v49 }
 0x304   : > { %v1194_v56 = vmax.f32 %v1190_v48, 0.0  ;;  %v1187_v57 = vsel %vm2207_vm13, %v1183_v55, 0.0  ;;  %v1181_v58 = vpop.permute.xlu1 %1180 }
 0x305   : > { %v1191_v60 = vadd.f32 %v1187_v57, %v1171_v24  ;;  %v1182_v53 = vsel %vm732_vm4, %v1179_v49, %v1181_v58  ;;  %v1185_v62 = vsel %vm732_vm4, %v1181_v58, %v1175_v35 }
 0x306   : > { %1202 = vst [vmem:[%s2034_s6 + $0x20] sm:$0xff] %v1194_v56  ;;  %v1206_v4 = vsub.f32 %v1110_v23, %v1194_v56  ;;  %v1189_v17 = vsel %vm2208_vm14, %v1185_v62, 0.0  ;;  %v1192_v8 = vadd.f32 %v1182_v53, %v1172_v34 }
 0x307   : > { %v1195_v5 = vmax.f32 %v1191_v60, 0.0  ;;  %v1193_v10 = vadd.f32 %v1189_v17, %v1173_v52 }
 0x308   : > { %1210 = vst [vmem:[%s2034_s6 + $0x40] sm:$0xff] %v1206_v4  ;;  %v1196_v7 = vmax.f32 %v1192_v8, 0.0 }
 0x309   : > { %1203 = vst [vmem:[%s2034_s6 + $0x28] sm:$0xff] %v1195_v5  ;;  %v1207_v46 = vsub.f32 %v1111_v6, %v1195_v5  ;;  %v1197_v23 = vmax.f32 %v1193_v10, 0.0 }
 0x30a   : > { %1204 = vst [vmem:[%s2034_s6 + $0x30] sm:$0xff] %v1196_v7  ;;  %v1208_v22 = vsub.f32 %v1112_v42, %v1196_v7 }
 0x30b   : > { %1211 = vst [vmem:[%s2034_s6 + $0x48] sm:$0xff] %v1207_v46  ;;  %1205 = vst [vmem:[%s2034_s6 + $0x38] sm:$0xff] %v1197_v23  ;;  %v1209_v59 = vsub.f32 %v1113_v1, %v1197_v23 }
 0x30c   : > { %1212 = vst [vmem:[%s2034_s6 + $0x50] sm:$0xff] %v1208_v22 }
 0x30d   : > { %1213 = vst [vmem:[%s2034_s6 + $0x58] sm:$0xff] %v1209_v59 }
 0x30e   : > { %1412 = shalt.err (!%p1409_p3)
}
 0x30f   : > { %s1413_s25 = scalar_lea.hbm %s2121_s11, 1536  ;;  %s1417_s28 = scalar_lea.hbm %s2179_s3, 3072 }
 0x310   : > { %p1414_p4 = scmp.ne.s32.totalorder %s2121_s11, %s1413_s25  ;;  %p1418_p9 = scmp.lt.s32.totalorder %s2121_s11, %s2179_s3 }
 0x311   : > { %p1419_p10 = scmp.lt.s32.totalorder %s1417_s28, %s1413_s25 }
 0x312   : > { %p1415_p7 = pnand %p1414_p4, %p1532_p5 }
 0x313   : > { %p1420_p11 = por %p1419_p10, %p1418_p9 }
 0x314   : > { %p1416_p8 = pneg %p1415_p7 }
 0x316   : > { %p1421_p12 = pnand %p1420_p11, %p1416_p8 }
 0x318   : > { %1424 = shalt.err (!%p1421_p12)
}
 0x319   : > { %s1471_s4 = smov 512   ;;  %s1472_s5 = smov 1024  }
 0x31a   : > { %s1473_s6 = smov 32  }
 0x31b   : > { %1346 = dma.vmem_to_hbm [thread:$0]  (%p1532_p5), %s2126_s8, 1536, %s2121_s11, %s2136_s16, %s1471_s4, %s1472_s5, %s1473_s6  }
 0x31c PF: > { %p1352_p13 = scmp.ge.s32.totalorder %s1459_s15, 2  ;;  %s1243_s7 = sand.u32 1, %s1447_s12  }
 0x31d   : > { %s1244_s9 = scalar_lea.sflag [#allocation3], %s1243_s7 }
 0x31e   : > { %p1349_p0 = pnand %p1352_p13, %p1536_p6 }
 0x320   : > { %p1350_p1 = pneg %p1349_p0 }
 0x322   : > { %1442 = dma.done.wait (%p1350_p1), %s1244_s9, 1536  }
 0x323   : > { %1444 = vsyncadd (%p1350_p1), %s1244_s9, 4294965760  ;;  %p13_p2 = scmp.ge.s32.totalorder %s1519_s18, 4   ;;  %s2209_s12 = smov %s1451_s13 }
 0x324   : > { %s2210_s13 = smov %s1455_s14  ;;  %s2211_s14 = smov %s1530_s21 }
 0x325   : > { %s2212_s15 = smov %s1519_s18  ;;  %15 = sbr.rel (!%p13_p2) target bundleno = 3 (0x3), region = 67 }
 0x32a   :  { %1249 = vsyncpa [#allocation3], 1 }
 0x32b   :  { %1251 = vsyncpa [#allocation3 + $0x1], 1 }

</bundles_post_ra>
